<compile_context>
chip_gen: v7x
topology: tpu7x:2x2x1
jax: 0.10.0
libtpu: 0.0.40
codegen_flags: <defaults>
</compile_context>

<pallas_src>
import jax
import jax.numpy as jnp
from jax import lax
from jax.experimental import pallas as pl
from jax.experimental.pallas import tpu as pltpu

EPS = 1e-9


def _grad_loss_kernel(sr_ref, hr_ref, sx_ref, sy_ref):
    # sr_ref, hr_ref: (1, 1, H, W) channel-1 tile of one batch element.
    # sx_ref, sy_ref: (1, 1, 1) per-batch Charbonnier sums for grad-x / grad-y.
    d = sr_ref[0, 0].astype(jnp.float32) - hr_ref[0, 0].astype(jnp.float32)  # (H, W)
    H, W = d.shape

    row = lax.broadcasted_iota(jnp.int32, (H, W), 0)
    col = lax.broadcasted_iota(jnp.int32, (H, W), 1)
    zero = jnp.zeros_like(d)

    # Horizontally shifted copies with zero boundary (emulates the pad=1 of
    # F.conv2d): left[y, x] = d[y, x-1], right[y, x] = d[y, x+1].
    left = jnp.where(col == 0, zero, pltpu.roll(d, 1, axis=1))
    right = jnp.where(col == W - 1, zero, pltpu.roll(d, W - 1, axis=1))

    # Factored Sobel: shared [1,2,1] smoothing and [1,0,-1] difference rows.
    s = left + 2.0 * d + right      # row-wise [1, 2, 1]
    dcol = left - right             # row-wise [1, 0, -1]

    def up(a):    # a[y-1, x], zero above the image
        return jnp.where(row == 0, zero, pltpu.roll(a, 1, axis=0))

    def down(a):  # a[y+1, x], zero below the image
        return jnp.where(row == H - 1, zero, pltpu.roll(a, H - 1, axis=0))

    # Cross-correlation with kx = [[1,0,-1],[2,0,-2],[1,0,-1]],
    #                        ky = [[1,2,1],[0,0,0],[-1,-2,-1]], padding=1.
    gx = up(dcol) + 2.0 * dcol + down(dcol)
    gy = up(s) - down(s)

    ex = jnp.sqrt(gx * gx + EPS)
    ey = jnp.sqrt(gy * gy + EPS)

    # Per-batch partial sums (no cross-grid-step accumulator -> batch axis is
    # embarrassingly parallel).
    sx_ref[...] = jnp.zeros_like(sx_ref) + jnp.sum(ex)
    sy_ref[...] = jnp.zeros_like(sy_ref) + jnp.sum(ey)


def gradient_loss(sr, hr):
    """sr, hr: (N, C, H, W) arrays (C >= 2). Returns scalar loss matching GradientLoss."""
    N, C, H, W = sr.shape
    assert C >= 2, "GradientLoss uses channel index 1"

    sx, sy = pl.pallas_call(
        _grad_loss_kernel,
        out_shape=(
            jax.ShapeDtypeStruct((N, 1, 1), jnp.float32),
            jax.ShapeDtypeStruct((N, 1, 1), jnp.float32),
        ),
        grid_spec=pltpu.PrefetchScalarGridSpec(
            num_scalar_prefetch=0,
            grid=(N,),
            in_specs=[
                # Only channel 1 of each input is DMA'd (block index 1 along C).
                pl.BlockSpec((1, 1, H, W), lambda n: (n, 1, 0, 0)),
                pl.BlockSpec((1, 1, H, W), lambda n: (n, 1, 0, 0)),
            ],
            out_specs=[
                pl.BlockSpec((1, 1, 1), lambda n: (n, 0, 0)),
                pl.BlockSpec((1, 1, 1), lambda n: (n, 0, 0)),
            ],
        ),
        compiler_params=pltpu.CompilerParams(
            dimension_semantics=("parallel",),
            vmem_limit_bytes=32 * 1024 * 1024,
        ),
    )(sr, hr)

    denom = jnp.float32(N * H * W)
    return jnp.sum(sx) / denom + jnp.sum(sy) / denom


def _reference(sr, hr):
    """Pure-JAX reference mirroring the PyTorch module (sanity check)."""
    kx = jnp.array([[1, 0, -1], [2, 0, -2], [1, 0, -1]], jnp.float32).reshape(1, 1, 3, 3)
    ky = jnp.array([[1, 2, 1], [0, 0, 0], [-1, -2, -1]], jnp.float32).reshape(1, 1, 3, 3)
    s = sr[:, 1:2].astype(jnp.float32)
    h = hr[:, 1:2].astype(jnp.float32)

    def conv(x, k):
        return jax.lax.conv_general_dilated(
            x, k, window_strides=(1, 1), padding=((1, 1), (1, 1)),
            dimension_numbers=("NCHW", "OIHW", "NCHW"))

    dx = conv(s, kx) - conv(h, kx)
    dy = conv(s, ky) - conv(h, ky)
    return jnp.mean(jnp.sqrt(dx * dx + EPS)) + jnp.mean(jnp.sqrt(dy * dy + EPS))


if __name__ == "__main__":
    key = jax.random.PRNGKey(0)
    k1, k2 = jax.random.split(key)
    N, C, H, W = 2, 4, 16, 16
    sr = jax.random.normal(k1, (N, C, H, W), dtype=jnp.float32)
    hr = jax.random.normal(k2, (N, C, H, W), dtype=jnp.float32)

    loss = jax.jit(gradient_loss)(sr, hr)
    jax.block_until_ready(loss)

    ref = _reference(sr, hr)
    assert jnp.allclose(loss, ref, rtol=1e-5, atol=1e-5), (loss, ref)
    print("KERNEL_OK")
</pallas_src>

<mosaic_0001>
module attributes {stable_mosaic.version = 11 : i64} {
  func.func @_grad_loss_kernel(%arg0: i32, %arg1: memref<1x1x16x16xf32, #tpu.memory_space<vmem>>, %arg2: memref<1x1x16x16xf32, #tpu.memory_space<vmem>>, %arg3: memref<1x1x1xf32, #tpu.memory_space<vmem>>, %arg4: memref<1x1x1xf32, #tpu.memory_space<vmem>>) attributes {dimension_semantics = [#tpu.dimension_semantics<parallel>], iteration_bounds = array<i64: 2>, scalar_prefetch = 0 : i64, scratch_operands = 0 : i64, tpu.core_type = #tpu.core_type<tc>, window_params = [{transform_indices = @transform_0, window_bounds = array<i64: 1, 1, 16, 16>}, {transform_indices = @transform_1, window_bounds = array<i64: 1, 1, 16, 16>}, {transform_indices = @transform_2, window_bounds = array<i64: 1, 1, 1>}, {transform_indices = @transform_3, window_bounds = array<i64: 1, 1, 1>}]} {
    %c0 = arith.constant 0 : index
    %c0_0 = arith.constant 0 : index
    %c0_1 = arith.constant 0 : index
    %c0_2 = arith.constant 0 : index
    %0 = vector.load %arg1[%c0, %c0_0, %c0_1, %c0_2] : memref<1x1x16x16xf32, #tpu.memory_space<vmem>>, vector<1x1x16x16xf32>
    %1 = vector.shape_cast %0 : vector<1x1x16x16xf32> to vector<16x16xf32>
    %c0_3 = arith.constant 0 : index
    %c0_4 = arith.constant 0 : index
    %c0_5 = arith.constant 0 : index
    %c0_6 = arith.constant 0 : index
    %2 = vector.load %arg2[%c0_3, %c0_4, %c0_5, %c0_6] : memref<1x1x16x16xf32, #tpu.memory_space<vmem>>, vector<1x1x16x16xf32>
    %3 = vector.shape_cast %2 : vector<1x1x16x16xf32> to vector<16x16xf32>
    %4 = arith.subf %1, %3 : vector<16x16xf32>
    %5 = tpu.iota {dimensions = array<i32: 0>} : vector<16x16xi32>
    %6 = tpu.iota {dimensions = array<i32: 1>} : vector<16x16xi32>
    %cst = arith.constant 0.000000e+00 : f32
    %7 = vector.broadcast %cst : f32 to vector<16x16xf32>
    %c0_i32 = arith.constant 0 : i32
    %8 = vector.broadcast %c0_i32 : i32 to vector<16x16xi32>
    %9 = arith.cmpi eq, %6, %8 : vector<16x16xi32>
    %c1_i32 = arith.constant 1 : i32
    %10 = tpu.dynamic_rotate %4 by %c1_i32 dim 1 : vector<16x16xf32>, i32 -> vector<16x16xf32>
    %11 = arith.select %9, %7, %10 : vector<16x16xi1>, vector<16x16xf32>
    %c15_i32 = arith.constant 15 : i32
    %12 = vector.broadcast %c15_i32 : i32 to vector<16x16xi32>
    %13 = arith.cmpi eq, %6, %12 : vector<16x16xi32>
    %c15_i32_7 = arith.constant 15 : i32
    %14 = tpu.dynamic_rotate %4 by %c15_i32_7 dim 1 : vector<16x16xf32>, i32 -> vector<16x16xf32>
    %15 = arith.select %13, %7, %14 : vector<16x16xi1>, vector<16x16xf32>
    %cst_8 = arith.constant 2.000000e+00 : f32
    %16 = vector.broadcast %cst_8 : f32 to vector<16x16xf32>
    %17 = arith.mulf %16, %4 : vector<16x16xf32>
    %18 = arith.addf %11, %17 : vector<16x16xf32>
    %19 = arith.addf %18, %15 : vector<16x16xf32>
    %20 = arith.subf %11, %15 : vector<16x16xf32>
    %c0_i32_9 = arith.constant 0 : i32
    %21 = vector.broadcast %c0_i32_9 : i32 to vector<16x16xi32>
    %22 = arith.cmpi eq, %5, %21 : vector<16x16xi32>
    %c1_i32_10 = arith.constant 1 : i32
    %23 = tpu.dynamic_rotate %20 by %c1_i32_10 dim 0 : vector<16x16xf32>, i32 -> vector<16x16xf32>
    %24 = arith.select %22, %7, %23 : vector<16x16xi1>, vector<16x16xf32>
    %cst_11 = arith.constant 2.000000e+00 : f32
    %25 = vector.broadcast %cst_11 : f32 to vector<16x16xf32>
    %26 = arith.mulf %25, %20 : vector<16x16xf32>
    %27 = arith.addf %24, %26 : vector<16x16xf32>
    %c15_i32_12 = arith.constant 15 : i32
    %28 = vector.broadcast %c15_i32_12 : i32 to vector<16x16xi32>
    %29 = arith.cmpi eq, %5, %28 : vector<16x16xi32>
    %c15_i32_13 = arith.constant 15 : i32
    %30 = tpu.dynamic_rotate %20 by %c15_i32_13 dim 0 : vector<16x16xf32>, i32 -> vector<16x16xf32>
    %31 = arith.select %29, %7, %30 : vector<16x16xi1>, vector<16x16xf32>
    %32 = arith.addf %27, %31 : vector<16x16xf32>
    %c0_i32_14 = arith.constant 0 : i32
    %33 = vector.broadcast %c0_i32_14 : i32 to vector<16x16xi32>
    %34 = arith.cmpi eq, %5, %33 : vector<16x16xi32>
    %c1_i32_15 = arith.constant 1 : i32
    %35 = tpu.dynamic_rotate %19 by %c1_i32_15 dim 0 : vector<16x16xf32>, i32 -> vector<16x16xf32>
    %36 = arith.select %34, %7, %35 : vector<16x16xi1>, vector<16x16xf32>
    %c15_i32_16 = arith.constant 15 : i32
    %37 = vector.broadcast %c15_i32_16 : i32 to vector<16x16xi32>
    %38 = arith.cmpi eq, %5, %37 : vector<16x16xi32>
    %c15_i32_17 = arith.constant 15 : i32
    %39 = tpu.dynamic_rotate %19 by %c15_i32_17 dim 0 : vector<16x16xf32>, i32 -> vector<16x16xf32>
    %40 = arith.select %38, %7, %39 : vector<16x16xi1>, vector<16x16xf32>
    %41 = arith.subf %36, %40 : vector<16x16xf32>
    %42 = arith.mulf %32, %32 : vector<16x16xf32>
    %cst_18 = arith.constant 9.99999971E-10 : f32
    %43 = vector.broadcast %cst_18 : f32 to vector<16x16xf32>
    %44 = arith.addf %42, %43 : vector<16x16xf32>
    %45 = math.sqrt %44 : vector<16x16xf32>
    %46 = arith.mulf %41, %41 : vector<16x16xf32>
    %cst_19 = arith.constant 9.99999971E-10 : f32
    %47 = vector.broadcast %cst_19 : f32 to vector<16x16xf32>
    %48 = arith.addf %46, %47 : vector<16x16xf32>
    %49 = math.sqrt %48 : vector<16x16xf32>
    %cst_20 = arith.constant 0.000000e+00 : f32
    %50 = vector.broadcast %cst_20 : f32 to vector<1x1x1xf32>
    %51 = vector.shape_cast %45 : vector<16x16xf32> to vector<1x16x16xf32>
    %cst_21 = arith.constant dense<0.000000e+00> : vector<1xf32>
    %52 = vector.multi_reduction <add>, %51, %cst_21 [1, 2] : vector<1x16x16xf32> to vector<1xf32>
    %53 = vector.shape_cast %52 : vector<1xf32> to vector<1x1x1xf32>
    %54 = vector.extract %53[0, 0, 0] : f32 from vector<1x1x1xf32>
    %55 = vector.broadcast %54 : f32 to vector<1x1x1xf32>
    %56 = arith.addf %50, %55 : vector<1x1x1xf32>
    %c0_22 = arith.constant 0 : index
    %c0_23 = arith.constant 0 : index
    %c0_24 = arith.constant 0 : index
    %57 = vector.load %arg3[%c0_22, %c0_23, %c0_24] : memref<1x1x1xf32, #tpu.memory_space<vmem>>, vector<1x1x1xf32>
    tpu.vector_store %arg3[%c0_22, %c0_23, %c0_24], %56 {strides = array<i32>} : memref<1x1x1xf32, #tpu.memory_space<vmem>>, vector<1x1x1xf32>,
    %cst_25 = arith.constant 0.000000e+00 : f32
    %58 = vector.broadcast %cst_25 : f32 to vector<1x1x1xf32>
    %59 = vector.shape_cast %49 : vector<16x16xf32> to vector<1x16x16xf32>
    %cst_26 = arith.constant dense<0.000000e+00> : vector<1xf32>
    %60 = vector.multi_reduction <add>, %59, %cst_26 [1, 2] : vector<1x16x16xf32> to vector<1xf32>
    %61 = vector.shape_cast %60 : vector<1xf32> to vector<1x1x1xf32>
    %62 = vector.extract %61[0, 0, 0] : f32 from vector<1x1x1xf32>
    %63 = vector.broadcast %62 : f32 to vector<1x1x1xf32>
    %64 = arith.addf %58, %63 : vector<1x1x1xf32>
    %c0_27 = arith.constant 0 : index
    %c0_28 = arith.constant 0 : index
    %c0_29 = arith.constant 0 : index
    %65 = vector.load %arg4[%c0_27, %c0_28, %c0_29] : memref<1x1x1xf32, #tpu.memory_space<vmem>>, vector<1x1x1xf32>
    tpu.vector_store %arg4[%c0_27, %c0_28, %c0_29], %64 {strides = array<i32>} : memref<1x1x1xf32, #tpu.memory_space<vmem>>, vector<1x1x1xf32>,
    return
  }
  func.func @transform_0(%arg0: i32) -> (i32, i32, i32, i32) {
    %c1_i32 = arith.constant 1 : i32
    %c0_i32 = arith.constant 0 : i32
    %c0_i32_0 = arith.constant 0 : i32
    %c0_i32_1 = arith.constant 0 : i32
    return %arg0, %c1_i32, %c0_i32, %c0_i32_0 : i32, i32, i32, i32
  }
  func.func @transform_1(%arg0: i32) -> (i32, i32, i32, i32) {
    %c1_i32 = arith.constant 1 : i32
    %c0_i32 = arith.constant 0 : i32
    %c0_i32_0 = arith.constant 0 : i32
    %c0_i32_1 = arith.constant 0 : i32
    return %arg0, %c1_i32, %c0_i32, %c0_i32_0 : i32, i32, i32, i32
  }
  func.func @transform_2(%arg0: i32) -> (i32, i32, i32) {
    %c0_i32 = arith.constant 0 : i32
    %c0_i32_0 = arith.constant 0 : i32
    %c0_i32_1 = arith.constant 0 : i32
    return %arg0, %c0_i32, %c0_i32_0 : i32, i32, i32
  }
  func.func @transform_3(%arg0: i32) -> (i32, i32, i32) {
    %c0_i32 = arith.constant 0 : i32
    %c0_i32_0 = arith.constant 0 : i32
    %c0_i32_1 = arith.constant 0 : i32
    return %arg0, %c0_i32, %c0_i32_0 : i32, i32, i32
  }
}

</mosaic_0001>

<bundles_post_ra>
// kernel: gradient_loss.1
= control target key start
LH: loop header
LB: loop body
LE: loop exit
PB: predicated region body
PF: predicated region fallthrough
CT: control target
= control target key end

     0   :  { %9 = vsyncpa [#allocation3], 0  ;;  %s900_s0 = inlined_call_operand.hbm [shape: f32[2,4,16,16], index: 0, kind: input, shape index: {}]   ;;  %s901_s1 = inlined_call_operand.hbm [shape: f32[2,4,16,16], index: 1, kind: input, shape index: {}]   ;;  %s902_s2 = inlined_call_operand.vmem [shape: f32[2,1,1], index: 2, kind: output, shape index: {0}]   ;;  %s903_s3 = inlined_call_operand.vmem [shape: f32[2,1,1], index: 3, kind: output, shape index: {1}]  }
   0x1   :  { %11 = vsyncpa [#allocation3 + $0x1], 0 }
   0x2   :  { %12 = vsyncpa [#allocation5], 0 }
   0x3   :  { %14 = vsyncpa [#allocation5 + $0x1], 0  ;;  %s713_s12 = smov 0   ;;  %s715_s13 = smov 0  }
   0x4   :  { %s717_s14 = smov 0   ;;  %s719_s15 = smov 0  }
   0x5 LB: > { %s732_s16 = sadd.s32 4294967295, %s684_s15   ;;  %s735_s17 = sadd.s32 1, %s684_s15   ;;  %s684_s15 = sphi %s719_s15, %s914_s15   ;;  %s680_s14 = sphi %s717_s14, %s913_s14   ;;  %s676_s13 = sphi %s715_s13, %s912_s13   ;;  %s672_s12 = sphi %s713_s12, %s911_s12  }
   0x6   : > { %s24_s18 = ssub.s32 %s684_s15, %s735_s17  ;;  %s27_s19 = sadd.s32 1, %s680_s14 }
   0x7   : > { %p25_p0 = scmp.eq.s32.totalorder %s24_s18, 0  ;;  %p34_p1 = scmp.ne.s32.totalorder %s680_s14, %s676_s13 }
   0x8   : > { %p35_p2 = scmp.eq.s32.totalorder %s684_s15, 0  ;;  %p40_p3 = scmp.ne.s32.totalorder %s676_s13, %s672_s12 }
   0x9   : > { %s745_s20 = scalar_select %p25_p0, %s680_s14, %s27_s19  }
   0xa   : > { %p36_p4 = por %p35_p2, %p34_p1  ;;  %p41_p5 = scmp.eq.s32.totalorder %s732_s16, 0 }
   0xb   : > { %p538_p6 = scmp.lt.s32.totalorder %s684_s15, 2  ;;  %s754_s22 = sand.u32 1, %s680_s14  }
   0xc   : > { %p749_p7 = por %p41_p5, %p40_p3  ;;  %s510_s23 = sshll.u32 %s754_s22, 4 }
   0xd   : > { %s521_s24 = sshll.u32 %s684_s15, 10  ;;  %s146_s28 = scalar_lea.vmem [#allocation2], %s510_s23 }
   0xe   : > { %s905_s21 = scalar_select %p749_p7, 1, 0 }
   0xf   : > { %s436_s27 = scalar_lea.hbm %s900_s0, %s521_s24  ;;  %s154_s29 = sshll.u32 %s146_s28, 4  ;;  %s767_s29 = int_to_ptr.vmem [resolvable:$true] %s154_s29 }
  0x10   : > { %s765_s30 = scalar_lea.hbm %s436_s27, 256  ;;  %p769_p8 = pnand %p538_p6, %p36_p4 }
  0x11   : > { %s143_s5 = scalar_lea.sflag [#allocation3], %s754_s22  ;;  %s614_s6 = scalar_lea.hbm %s436_s27, 512 }
  0x12   : > { %p585_p11 = scmp.ne.s32.totalorder %s765_s30, %s614_s6  ;;  %p586_p12 = pneg %p769_p8 }
  0x13   : > { %s589_s9 = scalar_lea.hbm %s900_s0, 2048  ;;  %p590_p1 = scmp.lt.u32.totalorder %s765_s30, %s900_s0 }
  0x14   : > { %p587_p13 = pnand %p586_p12, %p585_p11  ;;  %p591_p2 = scmp.lt.u32.totalorder %s589_s9, %s614_s6 }
  0x15   : > { %p593_p4 = scmp.lt.u32.totalorder %s614_s6, %s765_s30 }
  0x16   : > { %p588_p0 = pneg %p587_p13  ;;  %p592_p3 = por %p591_p2, %p590_p1 }
  0x18   : > { %p594_p5 = por %p593_p4, %p592_p3 }
  0x1a   : > { %p595_p6 = pnand %p594_p5, %p588_p0 }
  0x1c   : > { %598 = shalt.err (!%p595_p6)
}
  0x1d   : > { %s599_s12 = scalar_lea.vmem %s767_s29, 256  ;;  %s686_s18 = smov [#allocation2]  }
  0x1e   : > { %p600_p11 = scmp.ne.s32.totalorder %s767_s29, %s599_s12  ;;  %s604_s19 = sshll.u32 %s686_s18, 4  ;;  %s605_s19 = int_to_ptr.vmem [resolvable:$false] %s604_s19 }
  0x1f   : > { %s606_s25 = scalar_lea.vmem %s605_s19, 512  ;;  %p607_p10 = scmp.lt.s32.totalorder %s767_s29, %s605_s19 }
  0x20   : > { %p602_p13 = pnand %p600_p11, %p586_p12  ;;  %p608_p1 = scmp.lt.s32.totalorder %s606_s25, %s599_s12 }
  0x22   : > { %p603_p9 = pneg %p602_p13  ;;  %p609_p2 = por %p608_p1, %p607_p10 }
  0x24   : > { %p610_p3 = pnand %p609_p2, %p603_p9 }
  0x26   : > { %613 = shalt.err (!%p610_p3)
}
  0x27   : > { %s687_s26 = smov 128   ;;  %s688_s27 = smov 8  }
  0x28   : > { %534 = dma.hbm_to_vmem [thread:$0]  (!%p769_p8), %s765_s30, 256, %s767_s29, %s143_s5, %s687_s26, %s687_s26, %s688_s27  }
  0x29   : > { %p907_p9 = scmp.lt.s32.totalorder %s684_s15, 3  ;;  %p908_p10 = scmp.ge.s32.totalorder %s684_s15, 1 }
  0x2a   : > { %s443_s8 = scalar_lea.hbm %s901_s1, %s521_s24  ;;  %s168_s10 = scalar_lea.vmem [#allocation4], %s510_s23 }
  0x2b   : > { %p809_p0 = pnand %p908_p10, %p907_p9  ;;  %s818_s9 = scalar_lea.hbm %s443_s8, 256 }
  0x2c   : > { %s176_s11 = sshll.u32 %s168_s10, 4  ;;  %s165_s29 = scalar_lea.sflag [#allocation5], %s754_s22  ;;  %s822_s11 = int_to_ptr.vmem [resolvable:$true] %s176_s11 }
  0x2d   : > { %s645_s30 = scalar_lea.hbm %s443_s8, 512  ;;  %s620_s24 = scalar_lea.hbm %s901_s1, 2048 }
  0x2e   : > { %p616_p4 = scmp.ne.s32.totalorder %s818_s9, %s645_s30  ;;  %p621_p11 = scmp.lt.u32.totalorder %s818_s9, %s901_s1 }
  0x2f   : > { %p622_p13 = scmp.lt.u32.totalorder %s620_s24, %s645_s30  ;;  %p624_p2 = scmp.lt.u32.totalorder %s645_s30, %s818_s9 }
  0x30   : > { %p618_p5 = pnand %p616_p4, %p586_p12 }
  0x31   : > { %p623_p1 = por %p622_p13, %p621_p11 }
  0x32   : > { %p619_p6 = pneg %p618_p5 }
  0x33   : > { %p625_p3 = por %p624_p2, %p623_p1 }
  0x35   : > { %p626_p9 = pnand %p625_p3, %p619_p6 }
  0x37   : > { %629 = shalt.err (!%p626_p9)
}
  0x38   : > { %s630_s23 = scalar_lea.vmem %s822_s11, 256  ;;  %s689_s19 = smov [#allocation4]  }
  0x39   : > { %p631_p10 = scmp.ne.s32.totalorder %s822_s11, %s630_s23  ;;  %s635_s25 = sshll.u32 %s689_s19, 4  ;;  %s636_s25 = int_to_ptr.vmem [resolvable:$false] %s635_s25 }
  0x3a   : > { %s637_s6 = scalar_lea.vmem %s636_s25, 512  ;;  %p638_p7 = scmp.lt.s32.totalorder %s822_s11, %s636_s25 }
  0x3b   : > { %p633_p4 = pnand %p631_p10, %p586_p12  ;;  %p639_p11 = scmp.lt.s32.totalorder %s637_s6, %s630_s23 }
  0x3d   : > { %p634_p5 = pneg %p633_p4  ;;  %p640_p13 = por %p639_p11, %p638_p7 }
  0x3f   : > { %p641_p1 = pnand %p640_p13, %p634_p5 }
  0x41   : > { %644 = shalt.err (!%p641_p1)
}
  0x42   : > { %537 = dma.hbm_to_vmem [thread:$0]  (!%p769_p8), %s818_s9, 256, %s822_s11, %s165_s29, %s687_s26, %s687_s26, %s688_s27  }
  0x43   : > { %188 = sbr.rel (%p809_p0) target bundleno = 678 (0x2a6), region = 28  ;;  %s190_s7 = sand.u32 (!%p809_p0), 1, %s676_s13  }
  0x44   : > { %s517_s8 = sshll.u32 (!%p809_p0), %s190_s7, 4  ;;  %s191_s10 = scalar_lea.sflag (!%p809_p0), [#allocation3], %s190_s7 }
  0x45   : > { %s194_s30 = scalar_lea.vmem (!%p809_p0), [#allocation2], %s517_s8  ;;  %p910_p7 = scmp.ne.s32.totalorder (!%p809_p0), %s905_s21, 0 }
  0x4a   : > { %663 = dma.done.wait (%p910_p7), %s191_s10, 256  }
  0x4b   : > { %665 = vsyncadd (%p910_p7), %s191_s10, 4294967040  ;;  %s200_s4 = scalar_lea.sflag [#allocation5], %s190_s7  ;;  %s203_s22 = scalar_lea.vmem [#allocation4], %s517_s8 }
  0x4c   : > { %667 = dma.done.wait (%p910_p7), %s200_s4, 256  }
  0x4d   : > { %669 = vsyncadd (%p910_p7), %s200_s4, 4294967040  ;;  %v238_v0 = vld [vmem:[%s194_s30] sm:$0xff]  ;;  %v239_v2 = vld [vmem:[%s194_s30 + $0x8] sm:$0xff]  ;;  %s690_s26 = smov 16   ;;  %vm250_vm0 = vcmask 1047680   ;;  %s691_s21 = smov 113   ;;  %v244_v14 = vlaneseq }
  0x4e   : > { %v240_v1 = vld [vmem:[%s203_s22] sm:$0xff]  ;;  %v241_v4 = vld [vmem:[%s203_s22 + $0x8] sm:$0xff]  ;;  %s692_s27 = smov 127   ;;  %vm364_vm7 = vcmask 130048   ;;  %p232_p8 = scmp.lt.s32.totalorder %s732_s16, 1 }
  0x4f   : > { %v242_v3 = vsub.f32 %v238_v0, %v240_v1  ;;  %v243_v5 = vsub.f32 %v239_v2, %v241_v4  ;;  %v248_v15 = vand.u32 127, %v244_v14  ;;  %v245_v17 = vshrl.u32 %v244_v14, 7 }
  0x50   : > { %s916_s16 = smov (!%p232_p8, %s732_s16), 1 }
  0x51   : > { %251 = vrot.lane.b32.xlu0 %v242_v3, %s690_s26  ;;  %vm249_vm1 = vcmp.eq.s32.totalorder %v248_v15, 0  ;;  %vm273_vm2 = vcmp.eq.s32.totalorder %v248_v15, 15  ;;  %v282_v18 = vmul.f32 2.0, %v242_v3  ;;  %v283_v20 = vmul.f32 2.0, %v243_v5  ;;  %s234_s11 = scalar_lea.vmem %s902_s2, %s916_s16  ;;  %s237_s24 = scalar_lea.vmem %s903_s3, %s916_s16 }
  0x52   : > { %v246_v27 = vadd.s32 8, %v245_v17  ;;  %vm290_vm3 = vcmp.eq.s32.totalorder %v245_v17, 0  ;;  %vm294_vm4 = vcmp.lt.s32.totalorder %v245_v17, 1  ;;  %vm307_vm6 = vcmp.lt.s32.totalorder %v245_v17, 7 }
  0x54   : > { %vm304_vm5 = vcmp.eq.s32.totalorder %v246_v27, 15 }
  0x55   : > { %254 = vrot.lane.b32.xlu0 %v243_v5, %s690_s26 }
  0xc3   : > { %v252_v6 = vpop.permute.xlu0 %251 }
  0xc4   : > { %v253_v7 = vsel %vm250_vm0, %v252_v6, %v242_v3 }
  0xc5   : > { %257 = vrot.lane.b32.xlu1 %v253_v7, %s690_s26 }
  0xc7   : > { %v255_v8 = vpop.permute.xlu0 %254 }
  0xc8   : > { %v256_v9 = vsel %vm250_vm0, %v255_v8, %v243_v5 }
  0xc9   : > { %259 = vrot.lane.b32.xlu1 %v256_v9, %s690_s26 }
 0x137   : > { %v258_v10 = vpop.permute.xlu1 %257 }
 0x138   : > { %v261_v11 = vsel %vm250_vm0, %v258_v10, %v242_v3 }
 0x139   : > { %265 = vrot.lane.b32.xlu0 %v261_v11, %s691_s21 }
 0x13b   : > { %v260_v12 = vpop.permute.xlu1 %259 }
 0x13c   : > { %v262_v13 = vsel %vm250_vm0, %v260_v12, %v243_v5  ;;  %vm379_vm0 = vcmask 0  }
 0x13d   : > { %274 = vrot.lane.b32.xlu0 %v261_v11, %s692_s27  ;;  %267 = vrot.lane.b32.xlu1 %v262_v13, %s691_s21 }
 0x141   : > { %276 = vrot.lane.b32.xlu1 %v262_v13, %s692_s27 }
 0x1ab   : > { %v266_v16 = vpop.permute.xlu0 %265 }
 0x1ac   : > { %v271_v19 = vsel %vm249_vm1, 0.0, %v266_v16 }
 0x1ad   : > { %v284_v25 = vadd.f32 %v282_v18, %v271_v19 }
 0x1af   : > { %v268_v21 = vpop.permute.xlu1 %267  ;;  %v275_v22 = vpop.permute.xlu0 %274 }
 0x1b0   : > { %v272_v23 = vsel %vm249_vm1, 0.0, %v268_v21  ;;  %v280_v24 = vsel %vm273_vm2, 0.0, %v275_v22 }
 0x1b1   : > { %v288_v26 = vsub.f32 %v271_v19, %v280_v24  ;;  %v285_v28 = vadd.f32 %v283_v20, %v272_v23  ;;  %v286_v30 = vadd.f32 %v284_v25, %v280_v24 }
 0x1b3   : > { %v277_v29 = vpop.permute.xlu1 %276  ;;  %v292_v34 = vrot.slane %v288_v26, 7  ;;  %v305_v35 = vrot.slane %v288_v26, 1  ;;  %v299_v40 = vmul.f32 2.0, %v288_v26  ;;  %v314_v41 = vrot.slane %v286_v30, 7 }
 0x1b4   : > { %v281_v31 = vsel %vm273_vm2, 0.0, %v277_v29  ;;  %v320_v43 = vrot.slane %v286_v30, 1 }
 0x1b5   : > { %v287_v32 = vadd.f32 %v285_v28, %v281_v31  ;;  %v289_v33 = vsub.f32 %v272_v23, %v281_v31 }
 0x1b7   : > { %v293_v36 = vrot.slane %v289_v33, 7  ;;  %v300_v37 = vmul.f32 2.0, %v289_v33  ;;  %v306_v38 = vrot.slane %v289_v33, 1  ;;  %v315_v39 = vrot.slane %v287_v32, 7 }
 0x1b8   : > { %v321_v42 = vrot.slane %v287_v32, 1 }
 0x1b9   : > { %v295_v44 = vsel %vm294_vm4, %v292_v34, %v293_v36  ;;  %v296_v45 = vsel %vm294_vm4, %v293_v36, %v292_v34  ;;  %v309_v46 = vsel %vm307_vm6, %v306_v38, %v305_v35  ;;  %v316_v50 = vsel %vm294_vm4, %v314_v41, %v315_v39 }
 0x1ba   : > { %v297_v47 = vsel %vm290_vm3, 0.0, %v296_v45  ;;  %v302_v48 = vadd.f32 %v300_v37, %v295_v44  ;;  %v311_v49 = vsel %vm304_vm5, 0.0, %v309_v46  ;;  %v317_v52 = vsel %vm294_vm4, %v315_v39, %v314_v41 }
 0x1bb   : > { %v301_v51 = vadd.f32 %v299_v40, %v297_v47  ;;  %v322_v53 = vsel %vm307_vm6, %v320_v43, %v321_v42  ;;  %v323_v54 = vsel %vm307_vm6, %v321_v42, %v320_v43  ;;  %v308_v55 = vsel %vm307_vm6, %v305_v35, %v306_v38 }
 0x1bc   : > { %v313_v56 = vadd.f32 %v311_v49, %v302_v48  ;;  %v318_v57 = vsel %vm290_vm3, 0.0, %v317_v52  ;;  %v325_v58 = vsel %vm304_vm5, 0.0, %v323_v54 }
 0x1bd   : > { %v312_v59 = vadd.f32 %v308_v55, %v301_v51  ;;  %v326_v60 = vsub.f32 %v318_v57, %v322_v53  ;;  %v327_v61 = vsub.f32 %v316_v50, %v325_v58 }
 0x1be   : > { %v329_v62 = vmul.f32 %v313_v56, %v313_v56 }
 0x1bf   : > { %v328_v63 = vmul.f32 %v312_v59, %v312_v59  ;;  %v346_v0 = vmul.f32 %v326_v60, %v326_v60  ;;  %v347_v1 = vmul.f32 %v327_v61, %v327_v61 }
 0x1c0   : > { %v331_v2 = vadd.f32 1e-09, %v329_v62 }
 0x1c1   : > { %v330_v3 = vadd.f32 1e-09, %v328_v63  ;;  %v348_v4 = vadd.f32 1e-09, %v346_v0  ;;  %v349_v5 = vadd.f32 1e-09, %v347_v1 }
 0x1c2   : > { %576 = vrsqrt.f32 %v331_v2  ;;  %vm341_vm8 = vcmp.eq.f32.partialorder %v331_v2, inf  ;;  %vm343_vm10 = vcmp.eq.f32.partialorder %v331_v2, 0.0  ;;  %v344_v9 = vand.u32 2147483648, %v331_v2 }
 0x1c3   : > { %578 = vrsqrt.f32 %v348_v4  ;;  %vm352_vm9 = vcmp.eq.f32.partialorder %v348_v4, inf  ;;  %vm354_vm11 = vcmp.eq.f32.partialorder %v348_v4, 0.0  ;;  %v355_v12 = vand.u32 2147483648, %v348_v4 }
 0x1c4   : > { %580 = vrsqrt.f32 %v349_v5  ;;  %vm359_vm12 = vcmp.eq.f32.partialorder %v349_v5, inf  ;;  %vm361_vm13 = vcmp.eq.f32.partialorder %v349_v5, 0.0  ;;  %v362_v15 = vand.u32 2147483648, %v349_v5 }
 0x1c5   : > { %582 = vrsqrt.f32 %v330_v3  ;;  %vm334_vm14 = vcmp.eq.f32.partialorder %v330_v3, inf  ;;  %vm336_vm15 = vcmp.eq.f32.partialorder %v330_v3, 0.0  ;;  %v337_v22 = vand.u32 2147483648, %v330_v3 }
 0x1cc   : > { %v577_v6 = vpop.eup %576 }
 0x1cd   : > { %v579_v7 = vpop.eup %578  ;;  %v340_v8 = vmul.f32 %v577_v6, %v331_v2 }
 0x1ce   : > { %v581_v10 = vpop.eup %580  ;;  %v351_v11 = vmul.f32 %v579_v7, %v348_v4 }
 0x1cf   : > { %v583_v13 = vpop.eup %582  ;;  %v358_v14 = vmul.f32 %v581_v10, %v349_v5  ;;  %v342_v16 = vsel %vm341_vm8, %v331_v2, %v340_v8 }
 0x1d0   : > { %v353_v17 = vsel %vm352_vm9, %v348_v4, %v351_v11  ;;  %v333_v18 = vmul.f32 %v583_v13, %v330_v3  ;;  %v345_v19 = vsel %vm343_vm10, %v344_v9, %v342_v16 }
 0x1d1   : > { %v356_v20 = vsel %vm354_vm11, %v355_v12, %v353_v17  ;;  %v360_v21 = vsel %vm359_vm12, %v349_v5, %v358_v14  ;;  %v366_v26 = vsel %vm364_vm7, %v345_v19, 0.0 }
 0x1d2   : > { %v363_v23 = vsel %vm361_vm13, %v362_v15, %v360_v21  ;;  %v381_v24 = vsel %vm364_vm7, %v356_v20, 0.0  ;;  %v335_v25 = vsel %vm334_vm14, %v330_v3, %v333_v18 }
 0x1d3   : > { %v382_v27 = vsel %vm364_vm7, %v363_v23, 0.0  ;;  %v338_v28 = vsel %vm336_vm15, %v337_v22, %v335_v25 }
 0x1d4   : > { %v383_v29 = vadd.f32 %v382_v27, %v381_v24  ;;  %v365_v30 = vsel %vm364_vm7, %v338_v28, 0.0 }
 0x1d5   : > { %v367_v31 = vadd.f32 %v366_v26, %v365_v30 }
 0x1d6   : > { %384 = vadd.xlane.f32.xlu1 %v383_v29 }
 0x1d7   : > { %368 = vadd.xlane.f32.xlu0 %v367_v31 }
 0x263   : > { %v385_v32 = vpop.xlane.xlu1 %384 }
 0x264   : > { %v386_v33 = vrot.slane %v385_v32, 4  ;;  %v369_v34 = vpop.xlane.xlu0 %368 }
 0x265   : > { %v370_v35 = vrot.slane %v369_v34, 4 }
 0x266   : > { %v387_v36 = vadd.f32 %v386_v33, %v385_v32 }
 0x267   : > { %v371_v37 = vadd.f32 %v370_v35, %v369_v34 }
 0x268   : > { %v388_v38 = vrot.slane %v387_v36, 2 }
 0x269   : > { %v372_v39 = vrot.slane %v371_v37, 2 }
 0x26a   : > { %v389_v40 = vadd.f32 %v388_v38, %v387_v36 }
 0x26b   : > { %v373_v41 = vadd.f32 %v372_v39, %v371_v37 }
 0x26c   : > { %v390_v42 = vrot.slane %v389_v40, 1 }
 0x26d   : > { %v374_v43 = vrot.slane %v373_v41, 1 }
 0x26e   : > { %v391_v45 = vadd.f32 %v390_v42, %v389_v40 }
 0x26f   : > { %v375_v44 = vadd.f32 %v374_v43, %v373_v41 }
 0x271   : > { %523 = vpush %v375_v44 }
 0x272   : > { %525 = vpush %v391_v45 }
 0x2a2   : > { %s524_s29 = spop %523 }
 0x2a3   : > { %v377_v46 = vstv %s524_s29  ;;  %s526_s12 = spop %525 }
 0x2a4   : > { %380 = vst.msk [vmem:[%s234_s11] sm:$0x1] %vm379_vm0, %v377_v46  ;;  %v393_v47 = vstv %s526_s12 }
 0x2a5   : > { %395 = vst.msk [vmem:[%s237_s24] sm:$0x1] %vm379_vm0, %v393_v47 }
 0x2a6 PF: > { %p17_p12 = scmp.ge.s32.totalorder %s735_s17, 4   ;;  %s911_s12 = smov %s676_s13 }
 0x2a7   : > { %s912_s13 = smov %s680_s14  ;;  %s913_s14 = smov %s745_s20 }
 0x2a8   : > { %s914_s15 = smov %s735_s17  ;;  %19 = sbr.rel (!%p17_p12) target bundleno = 5 (0x5), region = 93 }
 0x2af   :  { %425 = vsyncpa [#allocation3], 1 }
 0x2b0   :  { %427 = vsyncpa [#allocation3 + $0x1], 1 }
 0x2b1   :  { %428 = vsyncpa [#allocation5], 1 }
 0x2b2   :  { %430 = vsyncpa [#allocation5 + $0x1], 1 }

</bundles_post_ra>
